<compile_context>
chip_gen: v7x
topology: tpu7x:2x2x1
jax: 0.10.0
libtpu: 0.0.40
codegen_flags: <defaults>
</compile_context>

<pallas_src>
import math

import jax
import jax.numpy as jnp
from jax import lax
from jax.experimental import pallas as pl
from jax.experimental.pallas import tpu as pltpu


# -----------------------------------------------------------------------------
# Mini-"KoBERT" encoder kernel: self-attention + FFN + 2x LayerNorm, CLS-only path.
# -----------------------------------------------------------------------------
ENC_WEIGHT_ORDER = [
    "wq", "wk", "wv", "wo", "bq", "bk", "bv", "bo",
    "ln1g", "ln1b", "wff1", "bff1", "wff2", "bff2", "ln2g", "ln2b",
]


def _layer_norm(x, g, b, eps=1e-12):
    mu = jnp.mean(x, axis=-1, keepdims=True)
    var = jnp.mean((x - mu) * (x - mu), axis=-1, keepdims=True)
    return (x - mu) * lax.rsqrt(var + eps) * g + b


def encoder_kernel(x_ref, mask_ref,
                   wq, wk, wv, wo, bq, bk, bv, bo,
                   ln1g, ln1b, wff1, bff1, wff2, bff2, ln2g, ln2b,
                   out_ref):
    x = x_ref[0]                      # [L, H]
    m = mask_ref[0]                   # [1, L]  (1.0 = token, 0.0 = pad)
    h_dim = x.shape[-1]
    scale = 1.0 / math.sqrt(h_dim)

    # CLS-only path: K and V need the full sequence, everything else only row 0.
    x0 = x[0:1, :]                    # [1, H]

    k = jnp.dot(x, wk[...], preferred_element_type=jnp.float32) + bk[...]     # [L, H]
    v = jnp.dot(x, wv[...], preferred_element_type=jnp.float32) + bv[...]     # [L, H]
    q0 = jnp.dot(x0, wq[...], preferred_element_type=jnp.float32) + bq[...]   # [1, H]

    scores = jnp.dot(q0, k.T, preferred_element_type=jnp.float32) * scale     # [1, L]
    scores = scores - (1.0 - m) * 1e9            # mask padded keys
    scores = scores - jnp.max(scores, axis=-1, keepdims=True)
    p = jnp.exp(scores)
    attn = p * pl.reciprocal(jnp.sum(p, axis=-1, keepdims=True), approx=True)

    ctx = jnp.dot(attn, v, preferred_element_type=jnp.float32)                # [1, H]
    attn_out = jnp.dot(ctx, wo[...], preferred_element_type=jnp.float32) + bo[...]
    h = _layer_norm(x0 + attn_out, ln1g[...], ln1b[...])                      # [1, H]

    ff = jnp.dot(h, wff1[...], preferred_element_type=jnp.float32) + bff1[...]
    ff = jax.nn.gelu(ff)
    ff = jnp.dot(ff, wff2[...], preferred_element_type=jnp.float32) + bff2[...]
    y = _layer_norm(h + ff, ln2g[...], ln2b[...])                             # [1, H]

    out_ref[0] = y                    # [CLS] token == last_hidden_state[:, 0, :]


def encoder_forward(params, emb, mask):
    """emb: [B, L, H] float32, mask: [B, L] float32 -> CLS output [B, H]."""
    B, L, H = emb.shape
    mask3 = mask.reshape(B, 1, L).astype(jnp.float32)
    weights = [params[n] for n in ENC_WEIGHT_ORDER]

    in_specs = [
        pl.BlockSpec((1, L, H), lambda b: (b, 0, 0)),
        pl.BlockSpec((1, 1, L), lambda b: (b, 0, 0)),
    ] + [pl.BlockSpec(w.shape, lambda b: (0, 0)) for w in weights]

    out = pl.pallas_call(
        encoder_kernel,
        out_shape=jax.ShapeDtypeStruct((B, 1, H), jnp.float32),
        grid=(B,),
        in_specs=in_specs,
        out_specs=pl.BlockSpec((1, 1, H), lambda b: (b, 0, 0)),
        compiler_params=pltpu.CompilerParams(
            dimension_semantics=("parallel",),           # independent batch rows
            vmem_limit_bytes=32 * 1024 * 1024),
    )(emb, mask3, *weights)
    return out.reshape(B, H)


# -----------------------------------------------------------------------------
# Fused 2-layer GRU (fused gates, hoisted input projection) + classification head.
# One grid step per session; per-session sequence length via scalar prefetch.
# Returns softmax((com_cls + pm_gru_final) @ W + b) per session.
# -----------------------------------------------------------------------------
GRU_WEIGHT_ORDER = ["wi0", "wh0", "bi0", "bh0", "wi1", "wh1", "bi1", "bh1"]


def gru_head_kernel(lens_ref, pm_ref, com_ref,
                    wi0, wh0, bi0, bh0, wi1, wh1, bi1, bh1, hw, hb,
                    out_ref, h0_ref, h1_ref, gi0_ref):
    b = pl.program_id(0)
    T = lens_ref[b]                              # dynamic #utterances this session
    H = h0_ref.shape[-1]

    x_seq = pm_ref[0]                            # [T_max, H]
    # Hoisted layer-0 input projection for ALL timesteps: one well-shaped matmul.
    gi0_ref[...] = jnp.dot(x_seq, wi0[...], preferred_element_type=jnp.float32) + bi0[...]
    h0_ref[...] = jnp.zeros_like(h0_ref)
    h1_ref[...] = jnp.zeros_like(h1_ref)

    def gru_update(gi, gh, h_prev):
        # fused gate layout along lanes: [ r | z | n ]
        r = jax.nn.sigmoid(gi[:, 0:H] + gh[:, 0:H])
        z = jax.nn.sigmoid(gi[:, H:2 * H] + gh[:, H:2 * H])
        n = jnp.tanh(gi[:, 2 * H:3 * H] + r * gh[:, 2 * H:3 * H])
        return (1.0 - z) * n + z * h_prev

    def body(t, carry):
        gi0_t = gi0_ref[pl.ds(t, 1), :]                                         # [1, 3H]
        gh0 = jnp.dot(h0_ref[...], wh0[...], preferred_element_type=jnp.float32) + bh0[...]
        h0_new = gru_update(gi0_t, gh0, h0_ref[...])
        # TODO(synk): nn.GRU inter-layer dropout (p=0.3) omitted (eval-mode semantics).
        gi1 = jnp.dot(h0_new, wi1[...], preferred_element_type=jnp.float32) + bi1[...]
        gh1 = jnp.dot(h1_ref[...], wh1[...], preferred_element_type=jnp.float32) + bh1[...]
        h1_new = gru_update(gi1, gh1, h1_ref[...])
        h0_ref[...] = h0_new
        h1_ref[...] = h1_new
        return carry

    lax.fori_loop(0, T, body, 0)                 # T == 0 -> h1 stays zeros (empty session)

    # Fused head: softmax((com_cls + pm_gru_final) @ W + b, axis=-1)
    z = com_ref[0] + h1_ref[...]                                                # [1, H]
    logits = jnp.dot(z, hw[...], preferred_element_type=jnp.float32) + hb[...]  # [1, C]
    logits = logits - jnp.max(logits, axis=-1, keepdims=True)
    e = jnp.exp(logits)
    out_ref[0] = e * pl.reciprocal(jnp.sum(e, axis=-1, keepdims=True), approx=True)


def gru_head_forward(gru_params, head_params, lens, pm_seq, com_cls):
    """lens: [B] int32, pm_seq: [B, T_max, H], com_cls: [B, H] -> probs [B, C]."""
    B, T_max, H = pm_seq.shape
    C = head_params["w"].shape[-1]
    com3 = com_cls.reshape(B, 1, H)
    weights = [gru_params[n] for n in GRU_WEIGHT_ORDER] + [head_params["w"], head_params["b"]]

    grid_spec = pltpu.PrefetchScalarGridSpec(
        num_scalar_prefetch=1,
        grid=(B,),
        in_specs=[
            pl.BlockSpec((1, T_max, H), lambda b, lens: (b, 0, 0)),
            pl.BlockSpec((1, 1, H), lambda b, lens: (b, 0, 0)),
        ] + [pl.BlockSpec(w.shape, lambda b, lens: (0, 0)) for w in weights],
        out_specs=pl.BlockSpec((1, 1, C), lambda b, lens: (b, 0, 0)),
        scratch_shapes=[pltpu.VMEM((1, H), jnp.float32),        # h0
                        pltpu.VMEM((1, H), jnp.float32),        # h1
                        pltpu.VMEM((T_max, 3 * H), jnp.float32)],  # hoisted gi0
    )
    out = pl.pallas_call(
        gru_head_kernel,
        out_shape=jax.ShapeDtypeStruct((B, 1, C), jnp.float32),
        grid_spec=grid_spec,
        compiler_params=pltpu.CompilerParams(
            dimension_semantics=("parallel",),
            vmem_limit_bytes=32 * 1024 * 1024),
    )(lens, pm_seq, com3, *weights)
    return out.reshape(B, C)


# -----------------------------------------------------------------------------
# Deterministic parameter construction (synthetic, not a checkpoint load).
# -----------------------------------------------------------------------------
def make_encoder_params(key, vocab, H, F):
    ks = jax.random.split(key, 8)
    n = lambda k, s, sc=0.02: sc * jax.random.normal(k, s, jnp.float32)
    return {
        "emb": n(ks[0], (vocab, H)),
        "wq": n(ks[1], (H, H)), "wk": n(ks[2], (H, H)),
        "wv": n(ks[3], (H, H)), "wo": n(ks[4], (H, H)),
        "bq": jnp.zeros((1, H), jnp.float32), "bk": jnp.zeros((1, H), jnp.float32),
        "bv": jnp.zeros((1, H), jnp.float32), "bo": jnp.zeros((1, H), jnp.float32),
        "ln1g": jnp.ones((1, H), jnp.float32), "ln1b": jnp.zeros((1, H), jnp.float32),
        "wff1": n(ks[5], (H, F)), "bff1": jnp.zeros((1, F), jnp.float32),
        "wff2": n(ks[6], (F, H)), "bff2": jnp.zeros((1, H), jnp.float32),
        "ln2g": jnp.ones((1, H), jnp.float32), "ln2b": jnp.zeros((1, H), jnp.float32),
    }


def make_gru_params(key, H):
    ks = jax.random.split(key, 4)
    sc = 1.0 / math.sqrt(H)
    u = lambda k, s: jax.random.uniform(k, s, jnp.float32, -sc, sc)
    # gates fused along the last dim in [r | z | n] order
    return {
        "wi0": u(ks[0], (H, 3 * H)), "wh0": u(ks[1], (H, 3 * H)),
        "bi0": jnp.zeros((1, 3 * H), jnp.float32), "bh0": jnp.zeros((1, 3 * H), jnp.float32),
        "wi1": u(ks[2], (H, 3 * H)), "wh1": u(ks[3], (H, 3 * H)),
        "bi1": jnp.zeros((1, 3 * H), jnp.float32), "bh1": jnp.zeros((1, 3 * H), jnp.float32),
    }


def make_head_params(key, H, C):
    k1, _ = jax.random.split(key)
    return {"w": 0.02 * jax.random.normal(k1, (H, C), jnp.float32),
            "b": jnp.zeros((1, C), jnp.float32)}


# -----------------------------------------------------------------------------
# ERCModel.forward equivalent
# -----------------------------------------------------------------------------
def erc_forward(params, data):
    input_ids, attention_mask, pm_input, labels = data
    H = params["com"]["emb"].shape[-1]
    B = input_ids.shape[0]

    # com_model(input_ids, attention_mask)['last_hidden_state'][:, 0, :]
    # TODO(synk): embedding gather stays as an XLA jnp.take (not moved in-kernel).
    com_emb = jnp.take(params["com"]["emb"], input_ids, axis=0)          # [B, L, H]
    com_cls = encoder_forward(params["com"], com_emb,
                              attention_mask.astype(jnp.float32))        # [B, H]

    # ---- PM branch: batch ALL utterances of ALL sessions into ONE encoder call ----
    lens_py = [len(utts) for utts in pm_input]
    T_max = max(max(lens_py) if lens_py else 0, 1)
    Lp = max([u.shape[1] for utts in pm_input for u in utts], default=1)

    all_ids, all_mask = [], []
    for utts in pm_input:
        for u in utts:                                                   # u: [1, l] ids
            l = u.shape[1]
            all_ids.append(jnp.pad(u, ((0, 0), (0, Lp - l))))
            all_mask.append(jnp.pad(jnp.ones((1, l), jnp.float32), ((0, 0), (0, Lp - l))))

    if all_ids:
        pm_ids = jnp.concatenate(all_ids, axis=0)                        # [T_total, Lp]
        pm_mask = jnp.concatenate(all_mask, axis=0)                      # [T_total, Lp]
        pm_emb = jnp.take(params["pm"]["emb"], pm_ids, axis=0)           # [T_total, Lp, H]
        pm_cls = encoder_forward(params["pm"], pm_emb, pm_mask)          # [T_total, H]
    else:
        pm_cls = jnp.zeros((0, H), jnp.float32)

    # Pack per-session CLS sequences into [B, T_max, H] (zeros for empty sessions).
    pm_seq = jnp.zeros((B, T_max, H), jnp.float32)
    off = 0
    for i, n in enumerate(lens_py):
        if n > 0:
            pm_seq = pm_seq.at[i, :n, :].set(pm_cls[off:off + n])
            off += n
    lens = jnp.asarray(lens_py, jnp.int32)

    # 2-layer GRU over each session + fused Linear/Softmax head (single pallas_call).
    final_output = gru_head_forward(params["gru"], params["head"],
                                    lens, pm_seq, com_cls)               # [B, C]
    return final_output, labels


# -----------------------------------------------------------------------------
if __name__ == "__main__":
    B, L, H, F, C, VOCAB = 2, 8, 32, 64, 7, 50

    root = jax.random.PRNGKey(0)
    k_com, k_pm, k_gru, k_head, k_ids, k_pm_ids, k_lab = jax.random.split(root, 7)

    params = {
        "com": make_encoder_params(k_com, VOCAB, H, F),
        "pm": make_encoder_params(k_pm, VOCAB, H, F),
        "gru": make_gru_params(k_gru, H),
        "head": make_head_params(k_head, H, C),
    }

    input_ids = jax.random.randint(k_ids, (B, L), 0, VOCAB)
    attention_mask = jnp.ones((B, L), jnp.int32).at[1, 6:].set(0)        # pad tail of item 1
    labels = jax.random.randint(k_lab, (B,), 0, C)

    # PM_input: session 0 has 3 prior utterances, session 1 has none (zeros branch).
    pk = jax.random.split(k_pm_ids, 3)
    pm_input = [
        [jax.random.randint(pk[0], (1, 6), 0, VOCAB),
         jax.random.randint(pk[1], (1, 8), 0, VOCAB),
         jax.random.randint(pk[2], (1, 5), 0, VOCAB)],
        [],
    ]

    data = (input_ids, attention_mask, pm_input, labels)
    final_output, out_labels = erc_forward(params, data)
    final_output = jax.block_until_ready(final_output)
    out_labels = jax.block_until_ready(out_labels)

    assert final_output.shape == (B, C)
    assert bool(jnp.all(jnp.isfinite(final_output)))
    print("KERNEL_OK")
</pallas_src>

<mosaic_0001>
module attributes {stable_mosaic.version = 11 : i64} {
  func.func @encoder_kernel(%arg0: i32, %arg1: memref<1x8x32xf32, #tpu.memory_space<vmem>>, %arg2: memref<1x1x8xf32, #tpu.memory_space<vmem>>, %arg3: memref<32x32xf32, #tpu.memory_space<vmem>>, %arg4: memref<32x32xf32, #tpu.memory_space<vmem>>, %arg5: memref<32x32xf32, #tpu.memory_space<vmem>>, %arg6: memref<32x32xf32, #tpu.memory_space<vmem>>, %arg7: memref<1x32xf32, #tpu.memory_space<vmem>>, %arg8: memref<1x32xf32, #tpu.memory_space<vmem>>, %arg9: memref<1x32xf32, #tpu.memory_space<vmem>>, %arg10: memref<1x32xf32, #tpu.memory_space<vmem>>, %arg11: memref<1x32xf32, #tpu.memory_space<vmem>>, %arg12: memref<1x32xf32, #tpu.memory_space<vmem>>, %arg13: memref<32x64xf32, #tpu.memory_space<vmem>>, %arg14: memref<1x64xf32, #tpu.memory_space<vmem>>, %arg15: memref<64x32xf32, #tpu.memory_space<vmem>>, %arg16: memref<1x32xf32, #tpu.memory_space<vmem>>, %arg17: memref<1x32xf32, #tpu.memory_space<vmem>>, %arg18: memref<1x32xf32, #tpu.memory_space<vmem>>, %arg19: memref<1x1x32xf32, #tpu.memory_space<vmem>>) attributes {dimension_semantics = [#tpu.dimension_semantics<parallel>], iteration_bounds = array<i64: 2>, scalar_prefetch = 0 : i64, scratch_operands = 0 : i64, tpu.core_type = #tpu.core_type<tc>, window_params = [{transform_indices = @transform_0, window_bounds = array<i64: 1, 8, 32>}, {transform_indices = @transform_1, window_bounds = array<i64: 1, 1, 8>}, {pipeline_mode = #tpu.pipeline_mode<synchronous>, transform_indices = @transform_2, window_bounds = array<i64: 32, 32>}, {pipeline_mode = #tpu.pipeline_mode<synchronous>, transform_indices = @transform_3, window_bounds = array<i64: 32, 32>}, {pipeline_mode = #tpu.pipeline_mode<synchronous>, transform_indices = @transform_4, window_bounds = array<i64: 32, 32>}, {pipeline_mode = #tpu.pipeline_mode<synchronous>, transform_indices = @transform_5, window_bounds = array<i64: 32, 32>}, {pipeline_mode = #tpu.pipeline_mode<synchronous>, transform_indices = @transform_6, window_bounds = array<i64: 1, 32>}, {pipeline_mode = #tpu.pipeline_mode<synchronous>, transform_indices = @transform_7, window_bounds = array<i64: 1, 32>}, {pipeline_mode = #tpu.pipeline_mode<synchronous>, transform_indices = @transform_8, window_bounds = array<i64: 1, 32>}, {pipeline_mode = #tpu.pipeline_mode<synchronous>, transform_indices = @transform_9, window_bounds = array<i64: 1, 32>}, {pipeline_mode = #tpu.pipeline_mode<synchronous>, transform_indices = @transform_10, window_bounds = array<i64: 1, 32>}, {pipeline_mode = #tpu.pipeline_mode<synchronous>, transform_indices = @transform_11, window_bounds = array<i64: 1, 32>}, {pipeline_mode = #tpu.pipeline_mode<synchronous>, transform_indices = @transform_12, window_bounds = array<i64: 32, 64>}, {pipeline_mode = #tpu.pipeline_mode<synchronous>, transform_indices = @transform_13, window_bounds = array<i64: 1, 64>}, {pipeline_mode = #tpu.pipeline_mode<synchronous>, transform_indices = @transform_14, window_bounds = array<i64: 64, 32>}, {pipeline_mode = #tpu.pipeline_mode<synchronous>, transform_indices = @transform_15, window_bounds = array<i64: 1, 32>}, {pipeline_mode = #tpu.pipeline_mode<synchronous>, transform_indices = @transform_16, window_bounds = array<i64: 1, 32>}, {pipeline_mode = #tpu.pipeline_mode<synchronous>, transform_indices = @transform_17, window_bounds = array<i64: 1, 32>}, {transform_indices = @transform_18, window_bounds = array<i64: 1, 1, 32>}]} {
    %c0 = arith.constant 0 : index
    %c0_0 = arith.constant 0 : index
    %c0_1 = arith.constant 0 : index
    %0 = vector.load %arg1[%c0, %c0_0, %c0_1] : memref<1x8x32xf32, #tpu.memory_space<vmem>>, vector<1x8x32xf32>
    %1 = vector.shape_cast %0 : vector<1x8x32xf32> to vector<8x32xf32>
    %c0_2 = arith.constant 0 : index
    %c0_3 = arith.constant 0 : index
    %c0_4 = arith.constant 0 : index
    %2 = vector.load %arg2[%c0_2, %c0_3, %c0_4] : memref<1x1x8xf32, #tpu.memory_space<vmem>>, vector<1x1x8xf32>
    %3 = vector.shape_cast %2 : vector<1x1x8xf32> to vector<1x8xf32>
    %4 = vector.extract_strided_slice %1 {offsets = [0, 0], sizes = [1, 32], strides = [1, 1]} : vector<8x32xf32> to vector<1x32xf32>
    %c0_5 = arith.constant 0 : index
    %c0_6 = arith.constant 0 : index
    %5 = vector.load %arg4[%c0_5, %c0_6] : memref<32x32xf32, #tpu.memory_space<vmem>>, vector<32x32xf32>
    %cst = arith.constant dense<0.000000e+00> : vector<8x32xf32>
    %6 = tpu.matmul %1, %5, %cst {dimension_numbers = #tpu.dot_dimension_numbers<[1], [0], [0], [1], [0, 0, 1, 1], [], []>} : vector<8x32xf32>, vector<32x32xf32>, vector<8x32xf32> -> vector<8x32xf32>
    %c0_7 = arith.constant 0 : index
    %c0_8 = arith.constant 0 : index
    %7 = vector.load %arg8[%c0_7, %c0_8] : memref<1x32xf32, #tpu.memory_space<vmem>>, vector<1x32xf32>
    %8 = vector.broadcast %7 : vector<1x32xf32> to vector<8x32xf32>
    %9 = arith.addf %6, %8 : vector<8x32xf32>
    %c0_9 = arith.constant 0 : index
    %c0_10 = arith.constant 0 : index
    %10 = vector.load %arg5[%c0_9, %c0_10] : memref<32x32xf32, #tpu.memory_space<vmem>>, vector<32x32xf32>
    %cst_11 = arith.constant dense<0.000000e+00> : vector<8x32xf32>
    %11 = tpu.matmul %1, %10, %cst_11 {dimension_numbers = #tpu.dot_dimension_numbers<[1], [0], [0], [1], [0, 0, 1, 1], [], []>} : vector<8x32xf32>, vector<32x32xf32>, vector<8x32xf32> -> vector<8x32xf32>
    %c0_12 = arith.constant 0 : index
    %c0_13 = arith.constant 0 : index
    %12 = vector.load %arg9[%c0_12, %c0_13] : memref<1x32xf32, #tpu.memory_space<vmem>>, vector<1x32xf32>
    %13 = vector.broadcast %12 : vector<1x32xf32> to vector<8x32xf32>
    %14 = arith.addf %11, %13 : vector<8x32xf32>
    %c0_14 = arith.constant 0 : index
    %c0_15 = arith.constant 0 : index
    %15 = vector.load %arg3[%c0_14, %c0_15] : memref<32x32xf32, #tpu.memory_space<vmem>>, vector<32x32xf32>
    %cst_16 = arith.constant dense<0.000000e+00> : vector<1x32xf32>
    %16 = tpu.matmul %4, %15, %cst_16 {dimension_numbers = #tpu.dot_dimension_numbers<[1], [0], [0], [1], [0, 0, 1, 1], [], []>} : vector<1x32xf32>, vector<32x32xf32>, vector<1x32xf32> -> vector<1x32xf32>
    %c0_17 = arith.constant 0 : index
    %c0_18 = arith.constant 0 : index
    %17 = vector.load %arg7[%c0_17, %c0_18] : memref<1x32xf32, #tpu.memory_space<vmem>>, vector<1x32xf32>
    %18 = arith.addf %16, %17 : vector<1x32xf32>
    %19 = tpu.transpose %9, [1, 0] : vector<8x32xf32> -> vector<32x8xf32>
    %cst_19 = arith.constant dense<0.000000e+00> : vector<1x8xf32>
    %20 = tpu.matmul %18, %19, %cst_19 {dimension_numbers = #tpu.dot_dimension_numbers<[1], [0], [0], [1], [0, 0, 1, 1], [], []>} : vector<1x32xf32>, vector<32x8xf32>, vector<1x8xf32> -> vector<1x8xf32>
    %cst_20 = arith.constant 0.176776692 : f32
    %21 = vector.broadcast %cst_20 : f32 to vector<1x8xf32>
    %22 = arith.mulf %20, %21 : vector<1x8xf32>
    %cst_21 = arith.constant 1.000000e+00 : f32
    %23 = vector.broadcast %cst_21 : f32 to vector<1x8xf32>
    %24 = arith.subf %23, %3 : vector<1x8xf32>
    %cst_22 = arith.constant 1.000000e+09 : f32
    %25 = vector.broadcast %cst_22 : f32 to vector<1x8xf32>
    %26 = arith.mulf %24, %25 : vector<1x8xf32>
    %27 = arith.subf %22, %26 : vector<1x8xf32>
    %cst_23 = arith.constant dense<0xFF800000> : vector<1xf32>
    %28 = vector.multi_reduction <maximumf>, %27, %cst_23 [1] : vector<1x8xf32> to vector<1xf32>
    %29 = vector.shape_cast %28 : vector<1xf32> to vector<1x1xf32>
    %30 = vector.broadcast %29 : vector<1x1xf32> to vector<1x8xf32>
    %31 = arith.subf %27, %30 : vector<1x8xf32>
    %32 = math.exp %31 : vector<1x8xf32>
    %cst_24 = arith.constant dense<0.000000e+00> : vector<1xf32>
    %33 = vector.multi_reduction <add>, %32, %cst_24 [1] : vector<1x8xf32> to vector<1xf32>
    %34 = vector.shape_cast %33 : vector<1xf32> to vector<1x1xf32>
    %35 = tpu.reciprocal %34 {approx = true} : vector<1x1xf32> -> vector<1x1xf32>
    %36 = vector.broadcast %35 : vector<1x1xf32> to vector<1x8xf32>
    %37 = arith.mulf %32, %36 : vector<1x8xf32>
    %cst_25 = arith.constant dense<0.000000e+00> : vector<1x32xf32>
    %38 = tpu.matmul %37, %14, %cst_25 {dimension_numbers = #tpu.dot_dimension_numbers<[1], [0], [0], [1], [0, 0, 1, 1], [], []>} : vector<1x8xf32>, vector<8x32xf32>, vector<1x32xf32> -> vector<1x32xf32>
    %c0_26 = arith.constant 0 : index
    %c0_27 = arith.constant 0 : index
    %39 = vector.load %arg6[%c0_26, %c0_27] : memref<32x32xf32, #tpu.memory_space<vmem>>, vector<32x32xf32>
    %cst_28 = arith.constant dense<0.000000e+00> : vector<1x32xf32>
    %40 = tpu.matmul %38, %39, %cst_28 {dimension_numbers = #tpu.dot_dimension_numbers<[1], [0], [0], [1], [0, 0, 1, 1], [], []>} : vector<1x32xf32>, vector<32x32xf32>, vector<1x32xf32> -> vector<1x32xf32>
    %c0_29 = arith.constant 0 : index
    %c0_30 = arith.constant 0 : index
    %41 = vector.load %arg10[%c0_29, %c0_30] : memref<1x32xf32, #tpu.memory_space<vmem>>, vector<1x32xf32>
    %42 = arith.addf %40, %41 : vector<1x32xf32>
    %43 = arith.addf %4, %42 : vector<1x32xf32>
    %c0_31 = arith.constant 0 : index
    %c0_32 = arith.constant 0 : index
    %44 = vector.load %arg11[%c0_31, %c0_32] : memref<1x32xf32, #tpu.memory_space<vmem>>, vector<1x32xf32>
    %c0_33 = arith.constant 0 : index
    %c0_34 = arith.constant 0 : index
    %45 = vector.load %arg12[%c0_33, %c0_34] : memref<1x32xf32, #tpu.memory_space<vmem>>, vector<1x32xf32>
    %cst_35 = arith.constant dense<0.000000e+00> : vector<1xf32>
    %46 = vector.multi_reduction <add>, %43, %cst_35 [1] : vector<1x32xf32> to vector<1xf32>
    %47 = vector.shape_cast %46 : vector<1xf32> to vector<1x1xf32>
    %cst_36 = arith.constant 3.200000e+01 : f32
    %48 = vector.broadcast %cst_36 : f32 to vector<1x1xf32>
    %49 = arith.divf %47, %48 : vector<1x1xf32>
    %50 = vector.broadcast %49 : vector<1x1xf32> to vector<1x32xf32>
    %51 = arith.subf %43, %50 : vector<1x32xf32>
    %52 = vector.broadcast %49 : vector<1x1xf32> to vector<1x32xf32>
    %53 = arith.subf %43, %52 : vector<1x32xf32>
    %54 = arith.mulf %51, %53 : vector<1x32xf32>
    %cst_37 = arith.constant dense<0.000000e+00> : vector<1xf32>
    %55 = vector.multi_reduction <add>, %54, %cst_37 [1] : vector<1x32xf32> to vector<1xf32>
    %56 = vector.shape_cast %55 : vector<1xf32> to vector<1x1xf32>
    %cst_38 = arith.constant 3.200000e+01 : f32
    %57 = vector.broadcast %cst_38 : f32 to vector<1x1xf32>
    %58 = arith.divf %56, %57 : vector<1x1xf32>
    %59 = vector.broadcast %49 : vector<1x1xf32> to vector<1x32xf32>
    %60 = arith.subf %43, %59 : vector<1x32xf32>
    %cst_39 = arith.constant 9.99999996E-13 : f32
    %61 = vector.broadcast %cst_39 : f32 to vector<1x1xf32>
    %62 = arith.addf %58, %61 : vector<1x1xf32>
    %63 = math.rsqrt %62 : vector<1x1xf32>
    %64 = vector.broadcast %63 : vector<1x1xf32> to vector<1x32xf32>
    %65 = arith.mulf %60, %64 : vector<1x32xf32>
    %66 = arith.mulf %65, %44 : vector<1x32xf32>
    %67 = arith.addf %66, %45 : vector<1x32xf32>
    %c0_40 = arith.constant 0 : index
    %c0_41 = arith.constant 0 : index
    %68 = vector.load %arg13[%c0_40, %c0_41] : memref<32x64xf32, #tpu.memory_space<vmem>>, vector<32x64xf32>
    %cst_42 = arith.constant dense<0.000000e+00> : vector<1x64xf32>
    %69 = tpu.matmul %67, %68, %cst_42 {dimension_numbers = #tpu.dot_dimension_numbers<[1], [0], [0], [1], [0, 0, 1, 1], [], []>} : vector<1x32xf32>, vector<32x64xf32>, vector<1x64xf32> -> vector<1x64xf32>
    %c0_43 = arith.constant 0 : index
    %c0_44 = arith.constant 0 : index
    %70 = vector.load %arg14[%c0_43, %c0_44] : memref<1x64xf32, #tpu.memory_space<vmem>>, vector<1x64xf32>
    %71 = arith.addf %69, %70 : vector<1x64xf32>
    %72 = arith.mulf %71, %71 : vector<1x64xf32>
    %73 = arith.mulf %71, %72 : vector<1x64xf32>
    %cst_45 = arith.constant 4.471500e-02 : f32
    %74 = vector.broadcast %cst_45 : f32 to vector<1x64xf32>
    %75 = arith.mulf %74, %73 : vector<1x64xf32>
    %76 = arith.addf %71, %75 : vector<1x64xf32>
    %cst_46 = arith.constant 0.797884583 : f32
    %77 = vector.broadcast %cst_46 : f32 to vector<1x64xf32>
    %78 = arith.mulf %77, %76 : vector<1x64xf32>
    %79 = math.tanh %78 : vector<1x64xf32>
    %cst_47 = arith.constant 1.000000e+00 : f32
    %80 = vector.broadcast %cst_47 : f32 to vector<1x64xf32>
    %81 = arith.addf %80, %79 : vector<1x64xf32>
    %cst_48 = arith.constant 5.000000e-01 : f32
    %82 = vector.broadcast %cst_48 : f32 to vector<1x64xf32>
    %83 = arith.mulf %82, %81 : vector<1x64xf32>
    %84 = arith.mulf %71, %83 : vector<1x64xf32>
    %c0_49 = arith.constant 0 : index
    %c0_50 = arith.constant 0 : index
    %85 = vector.load %arg15[%c0_49, %c0_50] : memref<64x32xf32, #tpu.memory_space<vmem>>, vector<64x32xf32>
    %cst_51 = arith.constant dense<0.000000e+00> : vector<1x32xf32>
    %86 = tpu.matmul %84, %85, %cst_51 {dimension_numbers = #tpu.dot_dimension_numbers<[1], [0], [0], [1], [0, 0, 1, 1], [], []>} : vector<1x64xf32>, vector<64x32xf32>, vector<1x32xf32> -> vector<1x32xf32>
    %c0_52 = arith.constant 0 : index
    %c0_53 = arith.constant 0 : index
    %87 = vector.load %arg16[%c0_52, %c0_53] : memref<1x32xf32, #tpu.memory_space<vmem>>, vector<1x32xf32>
    %88 = arith.addf %86, %87 : vector<1x32xf32>
    %89 = arith.addf %67, %88 : vector<1x32xf32>
    %c0_54 = arith.constant 0 : index
    %c0_55 = arith.constant 0 : index
    %90 = vector.load %arg17[%c0_54, %c0_55] : memref<1x32xf32, #tpu.memory_space<vmem>>, vector<1x32xf32>
    %c0_56 = arith.constant 0 : index
    %c0_57 = arith.constant 0 : index
    %91 = vector.load %arg18[%c0_56, %c0_57] : memref<1x32xf32, #tpu.memory_space<vmem>>, vector<1x32xf32>
    %cst_58 = arith.constant dense<0.000000e+00> : vector<1xf32>
    %92 = vector.multi_reduction <add>, %89, %cst_58 [1] : vector<1x32xf32> to vector<1xf32>
    %93 = vector.shape_cast %92 : vector<1xf32> to vector<1x1xf32>
    %cst_59 = arith.constant 3.200000e+01 : f32
    %94 = vector.broadcast %cst_59 : f32 to vector<1x1xf32>
    %95 = arith.divf %93, %94 : vector<1x1xf32>
    %96 = vector.broadcast %95 : vector<1x1xf32> to vector<1x32xf32>
    %97 = arith.subf %89, %96 : vector<1x32xf32>
    %98 = vector.broadcast %95 : vector<1x1xf32> to vector<1x32xf32>
    %99 = arith.subf %89, %98 : vector<1x32xf32>
    %100 = arith.mulf %97, %99 : vector<1x32xf32>
    %cst_60 = arith.constant dense<0.000000e+00> : vector<1xf32>
    %101 = vector.multi_reduction <add>, %100, %cst_60 [1] : vector<1x32xf32> to vector<1xf32>
    %102 = vector.shape_cast %101 : vector<1xf32> to vector<1x1xf32>
    %cst_61 = arith.constant 3.200000e+01 : f32
    %103 = vector.broadcast %cst_61 : f32 to vector<1x1xf32>
    %104 = arith.divf %102, %103 : vector<1x1xf32>
    %105 = vector.broadcast %95 : vector<1x1xf32> to vector<1x32xf32>
    %106 = arith.subf %89, %105 : vector<1x32xf32>
    %cst_62 = arith.constant 9.99999996E-13 : f32
    %107 = vector.broadcast %cst_62 : f32 to vector<1x1xf32>
    %108 = arith.addf %104, %107 : vector<1x1xf32>
    %109 = math.rsqrt %108 : vector<1x1xf32>
    %110 = vector.broadcast %109 : vector<1x1xf32> to vector<1x32xf32>
    %111 = arith.mulf %106, %110 : vector<1x32xf32>
    %112 = arith.mulf %111, %90 : vector<1x32xf32>
    %113 = arith.addf %112, %91 : vector<1x32xf32>
    %c0_63 = arith.constant 0 : index
    %c0_64 = arith.constant 0 : index
    %c0_65 = arith.constant 0 : index
    %114 = vector.load %arg19[%c0_63, %c0_64, %c0_65] : memref<1x1x32xf32, #tpu.memory_space<vmem>>, vector<1x1x32xf32>
    %115 = vector.shape_cast %114 : vector<1x1x32xf32> to vector<1x32xf32>
    %116 = vector.shape_cast %113 : vector<1x32xf32> to vector<1x1x32xf32>
    tpu.vector_store %arg19[%c0_63, %c0_64, %c0_65], %116 {strides = array<i32>} : memref<1x1x32xf32, #tpu.memory_space<vmem>>, vector<1x1x32xf32>,
    return
  }
  func.func @transform_0(%arg0: i32) -> (i32, i32, i32) {
    %c0_i32 = arith.constant 0 : i32
    %c0_i32_0 = arith.constant 0 : i32
    %c0_i32_1 = arith.constant 0 : i32
    return %arg0, %c0_i32, %c0_i32_0 : i32, i32, i32
  }
  func.func @transform_1(%arg0: i32) -> (i32, i32, i32) {
    %c0_i32 = arith.constant 0 : i32
    %c0_i32_0 = arith.constant 0 : i32
    %c0_i32_1 = arith.constant 0 : i32
    return %arg0, %c0_i32, %c0_i32_0 : i32, i32, i32
  }
  func.func @transform_2(%arg0: i32) -> (i32, i32) {
    %c0_i32 = arith.constant 0 : i32
    %c0_i32_0 = arith.constant 0 : i32
    %c0_i32_1 = arith.constant 0 : i32
    return %c0_i32, %c0_i32_0 : i32, i32
  }
  func.func @transform_3(%arg0: i32) -> (i32, i32) {
    %c0_i32 = arith.constant 0 : i32
    %c0_i32_0 = arith.constant 0 : i32
    %c0_i32_1 = arith.constant 0 : i32
    return %c0_i32, %c0_i32_0 : i32, i32
  }
  func.func @transform_4(%arg0: i32) -> (i32, i32) {
    %c0_i32 = arith.constant 0 : i32
    %c0_i32_0 = arith.constant 0 : i32
    %c0_i32_1 = arith.constant 0 : i32
    return %c0_i32, %c0_i32_0 : i32, i32
  }
  func.func @transform_5(%arg0: i32) -> (i32, i32) {
    %c0_i32 = arith.constant 0 : i32
    %c0_i32_0 = arith.constant 0 : i32
    %c0_i32_1 = arith.constant 0 : i32
    return %c0_i32, %c0_i32_0 : i32, i32
  }
  func.func @transform_6(%arg0: i32) -> (i32, i32) {
    %c0_i32 = arith.constant 0 : i32
    %c0_i32_0 = arith.constant 0 : i32
    %c0_i32_1 = arith.constant 0 : i32
    return %c0_i32, %c0_i32_0 : i32, i32
  }
  func.func @transform_7(%arg0: i32) -> (i32, i32) {
    %c0_i32 = arith.constant 0 : i32
    %c0_i32_0 = arith.constant 0 : i32
    %c0_i32_1 = arith.constant 0 : i32
    return %c0_i32, %c0_i32_0 : i32, i32
  }
  func.func @transform_8(%arg0: i32) -> (i32, i32) {
    %c0_i32 = arith.constant 0 : i32
    %c0_i32_0 = arith.constant 0 : i32
    %c0_i32_1 = arith.constant 0 : i32
    return %c0_i32, %c0_i32_0 : i32, i32
  }
  func.func @transform_9(%arg0: i32) -> (i32, i32) {
    %c0_i32 = arith.constant 0 : i32
    %c0_i32_0 = arith.constant 0 : i32
    %c0_i32_1 = arith.constant 0 : i32
    return %c0_i32, %c0_i32_0 : i32, i32
  }
  func.func @transform_10(%arg0: i32) -> (i32, i32) {
    %c0_i32 = arith.constant 0 : i32
    %c0_i32_0 = arith.constant 0 : i32
    %c0_i32_1 = arith.constant 0 : i32
    return %c0_i32, %c0_i32_0 : i32, i32
  }
  func.func @transform_11(%arg0: i32) -> (i32, i32) {
    %c0_i32 = arith.constant 0 : i32
    %c0_i32_0 = arith.constant 0 : i32
    %c0_i32_1 = arith.constant 0 : i32
    return %c0_i32, %c0_i32_0 : i32, i32
  }
  func.func @transform_12(%arg0: i32) -> (i32, i32) {
    %c0_i32 = arith.constant 0 : i32
    %c0_i32_0 = arith.constant 0 : i32
    %c0_i32_1 = arith.constant 0 : i32
    return %c0_i32, %c0_i32_0 : i32, i32
  }
  func.func @transform_13(%arg0: i32) -> (i32, i32) {
    %c0_i32 = arith.constant 0 : i32
    %c0_i32_0 = arith.constant 0 : i32
    %c0_i32_1 = arith.constant 0 : i32
    return %c0_i32, %c0_i32_0 : i32, i32
  }
  func.func @transform_14(%arg0: i32) -> (i32, i32) {
    %c0_i32 = arith.constant 0 : i32
    %c0_i32_0 = arith.constant 0 : i32
    %c0_i32_1 = arith.constant 0 : i32
    return %c0_i32, %c0_i32_0 : i32, i32
  }
  func.func @transform_15(%arg0: i32) -> (i32, i32) {
    %c0_i32 = arith.constant 0 : i32
    %c0_i32_0 = arith.constant 0 : i32
    %c0_i32_1 = arith.constant 0 : i32
    return %c0_i32, %c0_i32_0 : i32, i32
  }
  func.func @transform_16(%arg0: i32) -> (i32, i32) {
    %c0_i32 = arith.constant 0 : i32
    %c0_i32_0 = arith.constant 0 : i32
    %c0_i32_1 = arith.constant 0 : i32
    return %c0_i32, %c0_i32_0 : i32, i32
  }
  func.func @transform_17(%arg0: i32) -> (i32, i32) {
    %c0_i32 = arith.constant 0 : i32
    %c0_i32_0 = arith.constant 0 : i32
    %c0_i32_1 = arith.constant 0 : i32
    return %c0_i32, %c0_i32_0 : i32, i32
  }
  func.func @transform_18(%arg0: i32) -> (i32, i32, i32) {
    %c0_i32 = arith.constant 0 : i32
    %c0_i32_0 = arith.constant 0 : i32
    %c0_i32_1 = arith.constant 0 : i32
    return %arg0, %c0_i32, %c0_i32_0 : i32, i32, i32
  }
}

</mosaic_0001>

<bundles_post_ra>
// kernel: tpu_custom_call.1
= control target key start
LH: loop header
LB: loop body
LE: loop exit
PB: predicated region body
PF: predicated region fallthrough
CT: control target
= control target key end

     0   :  { %s2347_s0 = inlined_call_operand.hbm [shape: f32[2,8,32], index: 0, kind: input, shape index: {}]   ;;  %s2348_s1 = inlined_call_operand.vmem [shape: f32[2,1,8], index: 1, kind: input, shape index: {}]   ;;  %s2349_s2 = inlined_call_operand.vmem [shape: f32[32,32], index: 2, kind: input, shape index: {}]   ;;  %s2350_s3 = inlined_call_operand.vmem [shape: f32[32,32], index: 3, kind: input, shape index: {}]   ;;  %s2351_s4 = inlined_call_operand.vmem [shape: f32[32,32], index: 4, kind: input, shape index: {}]   ;;  %s2352_s5 = inlined_call_operand.hbm [shape: f32[32,32], index: 5, kind: input, shape index: {}]   ;;  %s2353_s6 = inlined_call_operand.vmem [shape: f32[1,32], index: 6, kind: input, shape index: {}]   ;;  %s2354_s7 = inlined_call_operand.vmem [shape: f32[1,32], index: 7, kind: input, shape index: {}]   ;;  %s2355_s8 = inlined_call_operand.vmem [shape: f32[1,32], index: 8, kind: input, shape index: {}]   ;;  %s2356_s9 = inlined_call_operand.vmem [shape: f32[1,32], index: 9, kind: input, shape index: {}]   ;;  %s2357_s10 = inlined_call_operand.vmem [shape: f32[1,32], index: 10, kind: input, shape index: {}]   ;;  %s2358_s11 = inlined_call_operand.vmem [shape: f32[1,32], index: 11, kind: input, shape index: {}]   ;;  %s2359_s12 = inlined_call_operand.hbm [shape: f32[32,64], index: 12, kind: input, shape index: {}]   ;;  %s2360_s13 = inlined_call_operand.vmem [shape: f32[1,64], index: 13, kind: input, shape index: {}]   ;;  %s2361_s14 = inlined_call_operand.vmem [shape: f32[64,32], index: 14, kind: input, shape index: {}]   ;;  %s2362_s15 = inlined_call_operand.vmem [shape: f32[1,32], index: 15, kind: input, shape index: {}]   ;;  %s2363_s16 = inlined_call_operand.vmem [shape: f32[1,32], index: 16, kind: input, shape index: {}]   ;;  %s2364_s17 = inlined_call_operand.vmem [shape: f32[1,32], index: 17, kind: input, shape index: {}]   ;;  %s2365_s18 = inlined_call_operand.hbm [shape: f32[2,1,32], index: 18, kind: output, shape index: {}]  }
   0x1   :  { %2374 = sst [smem:[#allocation14_spill]] %s2347_s0 }
   0x2   :  { %2375 = sst [smem:[#allocation15_spill]] %s2348_s1 }
   0x3   :  { %2376 = sst [smem:[#allocation16_spill]] %s2349_s2 }
   0x4   :  { %2377 = sst [smem:[#allocation17_spill]] %s2350_s3 }
   0x5   :  { %2378 = sst [smem:[#allocation18_spill]] %s2351_s4 }
   0x6   :  { %2379 = sst [smem:[#allocation19_spill]] %s2352_s5 }
   0x7   :  { %2380 = sst [smem:[#allocation20_spill]] %s2360_s13 }
   0x8   :  { %2381 = sst [smem:[#allocation21_spill]] %s2362_s15 }
   0x9   :  { %2382 = sst [smem:[#allocation22_spill]] %s2363_s16 }
   0xa   :  { %2383 = sst [smem:[#allocation23_spill]] %s2364_s17 }
   0xb   :  { %2384 = sst [smem:[#allocation24_spill]] %s2365_s18 }
   0xc   :  { %23 = vsyncpa [#allocation3], 0 }
   0xd   :  { %25 = vsyncpa [#allocation3 + $0x1], 0 }
   0xe   :  { %26 = vsyncpa [#allocation6], 0 }
   0xf   :  { %27 = vsyncpa [#allocation4], 0 }
  0x10   :  { %29 = vsyncpa [#allocation4 + $0x1], 0  ;;  %s1969_s27 = smov 0   ;;  %s1971_s28 = smov 0  }
  0x11   :  { %s1973_s29 = smov 0   ;;  %s1975_s30 = smov 0  }
  0x12 LB: > { %2385 = sst [smem:[#allocation12_spill]] %s1851_s27  ;;  %s1990_s0 = sadd.s32 4294967295, %s1863_s30   ;;  %s1863_s30 = sphi %s1975_s30, %s2416_s30   ;;  %s1859_s29 = sphi %s1973_s29, %s2415_s29   ;;  %s1855_s28 = sphi %s1971_s28, %s2414_s28   ;;  %s1851_s27 = sphi %s1969_s27, %s2413_s27  }
  0x13   : > { %s1436_s19 = sadd.s32 4294967294, %s1863_s30   ;;  %p55_p0 = scmp.ne.s32.totalorder %s1855_s28, %s1851_s27 }
  0x14   : > { %p2371_p1 = scmp.eq.s32.totalorder %s1990_s0, 0  ;;  %p447_p3 = scmp.eq.s32.totalorder %s1436_s19, 1 }
  0x15   : > { %p1437_p5 = scmp.ge.s32.totalorder %s1863_s30, 1  ;;  %p454_p7 = scmp.lt.s32.totalorder %s1863_s30, 3 }
  0x16   : > { %p1999_p4 = por %p2371_p1, %p55_p0  ;;  %p2004_p6 = por %p447_p3, %p55_p0 }
  0x17   : > { %p2009_p8 = pnand %p1437_p5, %p454_p7  ;;  %s1865_s22 = smov [#allocation5]  }
  0x18   : > { %s2386_s1 = scalar_select %p1999_p4, 1, 0 }
  0x19   : > { %s2387_s20 = scalar_select %p2004_p6, 1, 0 }
  0x1a   : > { %s475_s2 = sshll.u32 %s1865_s22, 4  ;;  %p1637_p9 = pneg %p2009_p8  ;;  %s2013_s2 = int_to_ptr.vmem [resolvable:$true] %s475_s2 }
  0x1b   : > { %2388 = sst [smem:[#allocation13_spill]] %s2387_s20  ;;  %s1866_s24 = smov [#allocation7]  }
  0x1c   : > { %p2020_p11 = pnand %p1637_p9, %p2371_p1  ;;  %s506_s25 = sshll.u32 %s1866_s24, 4  ;;  %s2024_s25 = int_to_ptr.vmem [resolvable:$true] %s506_s25 }
  0x1d   : > { %s2391_s5 = sld [smem:[#allocation19_spill]] }
  0x1e   : > { %p1709_p13 = pneg %p2020_p11 }
  0x23   : > { %s1707_s22 = scalar_lea.hbm %s2391_s5, 512 }
  0x24   : > { %p1708_p12 = scmp.ne.s32.totalorder %s2391_s5, %s1707_s22  ;;  %p1714_p5 = scmp.lt.u32.totalorder %s1707_s22, %s2391_s5 }
  0x26   : > { %p1710_p0 = pnand %p1709_p13, %p1708_p12 }
  0x28   : > { %p1711_p3 = pneg %p1710_p0 }
  0x2a   : > { %p1716_p7 = pnand %p1714_p5, %p1711_p3 }
  0x2c   : > { %1719 = shalt.err (!%p1716_p7)
}
  0x2d   : > { %s1720_s24 = scalar_lea.vmem %s2013_s2, 512  ;;  %p1728_p2 = scmp.lt.s32.totalorder %s2013_s2, %s2013_s2 }
  0x2e   : > { %p1721_p9 = scmp.ne.s32.totalorder %s2013_s2, %s1720_s24  ;;  %p1729_p12 = scmp.lt.s32.totalorder %s1720_s24, %s1720_s24 }
  0x30   : > { %p1723_p10 = pnand %p1721_p9, %p1709_p13  ;;  %p1730_p0 = por %p1729_p12, %p1728_p2 }
  0x32   : > { %p1724_p1 = pneg %p1723_p10 }
  0x34   : > { %p1731_p6 = pnand %p1730_p0, %p1724_p1 }
  0x36   : > { %1734 = shalt.err (!%p1731_p6)
}
  0x37   : > { %s1867_s17 = smov 128   ;;  %s1868_s18 = smov 8  }
  0x38   : > { %1640 = dma.hbm_to_vmem [thread:$0]  (!%p2020_p11), %s2391_s5, 512, %s2013_s2, [#allocation6], %s1867_s17, %s1867_s17, %s1868_s18  }
  0x39   : > { %s1735_s22 = scalar_lea.hbm %s2359_s12, 512 }
  0x3a   : > { %p1736_p2 = scmp.ne.s32.totalorder %s2359_s12, %s1735_s22  ;;  %p1742_p10 = scmp.lt.u32.totalorder %s1735_s22, %s2359_s12 }
  0x3c   : > { %p1738_p1 = pnand %p1736_p2, %p1709_p13 }
  0x3e   : > { %p1739_p6 = pneg %p1738_p1 }
  0x40   : > { %p1744_p3 = pnand %p1742_p10, %p1739_p6 }
  0x42   : > { %1747 = shalt.err (!%p1744_p3)
}
  0x43   : > { %s1748_s2 = scalar_lea.vmem %s2024_s25, 512  ;;  %p1756_p12 = scmp.lt.s32.totalorder %s2024_s25, %s2024_s25 }
  0x44   : > { %p1749_p5 = scmp.ne.s32.totalorder %s2024_s25, %s1748_s2  ;;  %p1757_p0 = scmp.lt.s32.totalorder %s1748_s2, %s1748_s2 }
  0x46   : > { %p1751_p7 = pnand %p1749_p5, %p1709_p13  ;;  %p1758_p2 = por %p1757_p0, %p1756_p12 }
  0x48   : > { %p1752_p9 = pneg %p1751_p7 }
  0x4a   : > { %p1759_p1 = pnand %p1758_p2, %p1752_p9 }
  0x4c   : > { %1762 = shalt.err (!%p1759_p1)
}
  0x4d   : > { %1643 = dma.hbm_to_vmem [thread:$0]  (!%p2020_p11), %s2359_s12, 512, %s2024_s25, [#allocation6], %s1867_s17, %s1867_s17, %s1868_s18  }
  0x4e   : > { %s2079_s16 = sadd.s32 1, %s1863_s30   ;;  %s42_s23 = sadd.s32 1, %s1859_s29 }
  0x4f   : > { %s39_s27 = ssub.s32 %s1863_s30, %s2079_s16  ;;  %p49_p13 = scmp.ne.s32.totalorder %s1859_s29, %s1855_s28 }
  0x50   : > { %p40_p6 = scmp.eq.s32.totalorder %s39_s27, 0  ;;  %p50_p10 = scmp.eq.s32.totalorder %s1863_s30, 0 }
  0x51   : > { %p2392_p3 = scmp.eq.s32.totalorder %s1990_s0, 1  ;;  %p1654_p7 = scmp.lt.s32.totalorder %s1863_s30, 2 }
  0x52   : > { %s2095_s26 = scalar_select %p40_p6, %s1859_s29, %s42_s23  }
  0x53   : > { %p2089_p5 = por %p2392_p3, %p49_p13  ;;  %p51_p9 = por %p50_p10, %p49_p13 }
  0x54   : > { %s535_s19 = sand.u32 1, %s1859_s29   ;;  %s1442_s25 = sshll.u32 %s1863_s30, 7 }
  0x55   : > { %s2393_s20 = scalar_select %p2089_p5, 1, 0 }
  0x56   : > { %s1441_s22 = sshll.u32 %s535_s19, 3  ;;  %s2394_s24 = sld [smem:[#allocation14_spill]] }
  0x57   : > { %s539_s13 = scalar_lea.vmem [#allocation2], %s1441_s22  ;;  %p2106_p11 = pnand %p1654_p7, %p51_p9 }
  0x58   : > { %s546_s15 = sshll.u32 %s539_s13, 4  ;;  %s536_s27 = scalar_lea.sflag [#allocation3], %s535_s19  ;;  %s2104_s15 = int_to_ptr.vmem [resolvable:$true] %s546_s15 }
  0x59   : > { %p1765_p0 = pneg %p2106_p11 }
  0x5c   : > { %s2102_s2 = scalar_lea.hbm %s2394_s24, %s1442_s25  ;;  %s1768_s17 = scalar_lea.hbm %s2394_s24, 256 }
  0x5d   : > { %s1763_s5 = scalar_lea.hbm %s2102_s2, 128  ;;  %p1769_p13 = scmp.lt.u32.totalorder %s2102_s2, %s2394_s24 }
  0x5e   : > { %p1764_p12 = scmp.ne.s32.totalorder %s2102_s2, %s1763_s5  ;;  %p1770_p6 = scmp.lt.u32.totalorder %s1768_s17, %s1763_s5 }
  0x5f   : > { %p1772_p3 = scmp.lt.u32.totalorder %s1763_s5, %s2102_s2 }
  0x60   : > { %p1766_p2 = pnand %p1765_p0, %p1764_p12  ;;  %p1771_p10 = por %p1770_p6, %p1769_p13 }
  0x62   : > { %p1767_p1 = pneg %p1766_p2  ;;  %p1773_p7 = por %p1772_p3, %p1771_p10 }
  0x64   : > { %p1774_p9 = pnand %p1773_p7, %p1767_p1 }
  0x66   : > { %1777 = shalt.err (!%p1774_p9)
}
  0x67   : > { %s1778_s19 = scalar_lea.vmem %s2104_s15, 128  ;;  %s1869_s25 = smov [#allocation2]  }
  0x68   : > { %p1779_p12 = scmp.ne.s32.totalorder %s2104_s15, %s1778_s19  ;;  %s1783_s22 = sshll.u32 %s1869_s25, 4  ;;  %s1784_s22 = int_to_ptr.vmem [resolvable:$false] %s1783_s22 }
  0x69   : > { %s1785_s18 = scalar_lea.vmem %s1784_s22, 256  ;;  %p1786_p4 = scmp.lt.s32.totalorder %s2104_s15, %s1784_s22 }
  0x6a   : > { %p1781_p2 = pnand %p1779_p12, %p1765_p0  ;;  %p1787_p13 = scmp.lt.s32.totalorder %s1785_s18, %s1778_s19 }
  0x6c   : > { %p1782_p5 = pneg %p1781_p2  ;;  %p1788_p6 = por %p1787_p13, %p1786_p4 }
  0x6e   : > { %p1789_p10 = pnand %p1788_p6, %p1782_p5 }
  0x70   : > { %1792 = shalt.err (!%p1789_p10)
}
  0x71   : > { %1647 = dma.hbm_to_vmem [thread:$0]  (!%p2106_p11), %s2102_s2, 128, %s2104_s15, %s536_s27  }
  0x72   : > { %561 = sbr.rel (%p2009_p8) target bundleno = 2413 (0x96d), region = 92  ;;  %s2138_s5 = sand.u32 (!%p2009_p8), 1, %s1855_s28  }
  0x73   : > { %s1444_s17 = sshll.u32 (!%p2009_p8), %s2138_s5, 3  ;;  %s564_s13 = scalar_lea.sflag (!%p2009_p8), [#allocation3], %s2138_s5 }
  0x74   : > { %s2142_s19 = scalar_lea.vmem (!%p2009_p8), [#allocation2], %s1444_s17  ;;  %p2396_p4 = scmp.ne.s32.totalorder (!%p2009_p8), %s2386_s1, 0 }
  0x79   : > { %1838 = dma.done.wait (%p2396_p4), %s564_s13, 128  }
  0x7a   : > { %1840 = vsyncadd (%p2396_p4), %s564_s13, 4294967168  ;;  %p2397_p5 = scmp.eq.s32.totalorder %s1990_s0, 0 }
  0x7c   : > { %1842 = dma.done.wait (%p2397_p5), [#allocation6], 1024   ;;  %p2398_p8 = pmov %p2397_p5 }
  0x7d   : > { %v1870_v0 = vmov 0.0|0.0   ;;  %vm1871_vm0 = vmmov 0   ;;  %v1872_v1 = vmov 0.0   ;;  %s2399_s3 = sld [smem:[#allocation17_spill]]  ;;  %s2400_s25 = sld [smem:[#allocation16_spill]]  ;;  %v2191_v16 = vld [vmem:[%s2142_s19] sm:$0xff] }
  0x7e   : > { %1844 = vsyncadd (%p2398_p8), [#allocation6], 4294966272  ;;  %1583 = vmatprep.subr.bf16.mxu1 %v1870_v0  ;;  %1595 = vmatprep.subr.bf16.mxu0 %v1870_v0  ;;  %s2401_s4 = sld [smem:[#allocation18_spill]]  ;;  %vm646_vm1 = vcmask 261120   ;;  %v1447_v21 = vld [vmem:[%s2354_s7] ss:$0 sm:$0xff] }
  0x7f   : > { %1507 = vmatprep.mubr.msk.f32.mxu1 %vm1871_vm0, %v1872_v1  ;;  %1529 = vmatprep.mubr.msk.f32.mxu0 %vm1871_vm0, %v1872_v1  ;;  %v805_v22 = vld [vmem:[%s2353_s6] sm:$0x1]  ;;  %p630_p11 = scmp.lt.s32.totalorder %s1990_s0, 1  ;;  %s2402_s2 = sld [smem:[#allocation15_spill]]  ;;  %vm956_vm2 = vcmask 57344   ;;  %v1042_v46 = vld [vmem:[#allocation5] sm:$0xff] }
  0x80   : > { %v1449_v29 = vld [vmem:[%s2355_s8] ss:$0 sm:$0xff]  ;;  %v1043_v47 = vld [vmem:[#allocation5 + $0x8] sm:$0xff]  ;;  %v1045_v50 = vld [vmem:[#allocation5 + $0x18] sm:$0xff]  ;;  %vm968_vm3 = vcmask 64512   ;;  %vm1123_vm4 = vcmask 253952  }
  0x81   : > { %s631_s13 = scalar_select %p630_p11, %s1990_s0, 1  ;;  %v1044_v48 = vld [vmem:[#allocation5 + $0x10] sm:$0xff]  ;;  %v1602_v49 = vpack.c.bf16 %v1043_v47, %v1042_v46  ;;  %vm1236_vm5 = vcmask 523264  }
  0x82   : > { %v1605_v51 = vpack.c.bf16 %v1045_v50, %v1044_v48  ;;  %v1046_v57 = vld [vmem:[%s2356_s9] sm:$0x1]  ;;  %s2403_s27 = sld [smem:[#allocation20_spill]]  ;;  %s2404_s17 = sld [smem:[#allocation21_spill]] }
  0x83   : > { %v635_v2 = vld [vmem:[%s2399_s3] sm:$0xff]  ;;  %v636_v3 = vld [vmem:[%s2399_s3 + $0x8] sm:$0xff]  ;;  %v637_v7 = vld [vmem:[%s2399_s3 + $0x10] sm:$0xff]  ;;  %s2405_s21 = sld [smem:[#allocation22_spill]]  ;;  %s2406_s19 = sld [smem:[#allocation23_spill]] }
  0x84   : > { %v801_v4 = vld [vmem:[%s2400_s25] sm:$0xff]  ;;  %v1584_v5 = vpack.c.bf16 %v636_v3, %v635_v2  ;;  %v802_v6 = vld [vmem:[%s2400_s25 + $0x8] sm:$0xff]  ;;  %v638_v8 = vld [vmem:[%s2399_s3 + $0x18] sm:$0xff]  ;;  %s1458_s23 = sshll.u32 %s1990_s0, 4  ;;  %s2407_s3 = sld [smem:[#allocation24_spill]] }
  0x85   : > { %v1596_v9 = vpack.c.bf16 %v802_v6, %v801_v4  ;;  %v803_v10 = vld [vmem:[%s2400_s25 + $0x10] sm:$0xff]  ;;  %v804_v11 = vld [vmem:[%s2400_s25 + $0x18] sm:$0xff]  ;;  %v1587_v12 = vpack.c.bf16 %v638_v8, %v637_v7  ;;  %v720_v14 = vld [vmem:[%s2401_s4] sm:$0xff]  ;;  %s632_s15 = scalar_lea.vmem %s2402_s2, %s631_s13  ;;  %s1330_s13 = scalar_lea.sflag [#allocation4], %s2138_s5 }
  0x86   : > { %1585 = vmatpush3.bf16.msra.mxu1 %v1584_v5  ;;  %v1599_v13 = vpack.c.bf16 %v804_v11, %v803_v10  ;;  %v721_v15 = vld [vmem:[%s2401_s4 + $0x8] sm:$0xff]  ;;  %v722_v18 = vld [vmem:[%s2401_s4 + $0x10] sm:$0xff]  ;;  %v723_v19 = vld [vmem:[%s2401_s4 + $0x18] sm:$0xff]  ;;  %p2408_p1 = scmp.ne.s32.totalorder %s2393_s20, 0  ;;  %s1873_s0 = smov [#allocation8]  }
  0x87   : > { %1586 = vmatprep.subr.bf16.mxu1 %v1870_v0  ;;  %1597 = vmatpush3.bf16.msra.mxu0 %v1596_v9  ;;  %v1590_v17 = vpack.c.bf16 %v721_v15, %v720_v14  ;;  %v1593_v20 = vpack.c.bf16 %v723_v19, %v722_v18  ;;  %v634_v33 = vld [vmem:[%s632_s15] sm:$0x1]  ;;  %v1141_v6 = vld [vmem:[#allocation7 + $0x8] sm:$0xff]  ;;  %v1143_v9 = vld [vmem:[#allocation7 + $0x18] sm:$0xff] }
  0x88   : > { %1598 = vmatprep.subr.bf16.mxu0 %v1870_v0  ;;  %v953_v34 = vsub.f32 1.0, %v634_v33  ;;  %v1142_v8 = vld [vmem:[#allocation7 + $0x10] sm:$0xff] }
  0x89   : > { %v1611_v10 = vpack.c.bf16 %v1143_v9, %v1142_v8  ;;  %v1121_v15 = vld [vmem:[%s2357_s10] sm:$0x1] }
  0x8a   : > { %1588 = vmatpush3.bf16.msra.mxu1 %v1587_v12  ;;  %v954_v35 = vmul.f32 1e+09, %v953_v34  ;;  %s2302_s4 = scalar_lea.hbm %s2407_s3, %s1458_s23 }
  0x8b   : > { %1600 = vmatpush3.bf16.msra.mxu0 %v1599_v13  ;;  %1589 = vmatprep.subr.bf16.mxu1 %v1870_v0 }
  0x8c   : > { %1601 = vmatprep.subr.bf16.mxu0 %v1870_v0 }
  0x8d   : > { %1508 = vmatmul.mubr.msk.f32.vlgmr.msra.gmra.mrb[0].mxu1 %vm646_vm1, %v2191_v16 }
  0x8e   : > { %1530 = vmatmul.mubr.msk.f32.vlgmr.msra.gmra.mrb[0].mxu0 %vm646_vm1, %v2191_v16  ;;  %1591 = vmatpush3.bf16.msra.mxu1 %v1590_v17  ;;  %v1122_v17 = vld [vmem:[%s2358_s11] sm:$0x1] }
  0x8f   : > { %1592 = vmatprep.subr.bf16.mxu1 %v1870_v0  ;;  %1518 = vmatprep.mubr.msk.f32.mxu1 %vm1871_vm0, %v1872_v1 }
  0x90   : > { %1550 = vmatprep.mubr.msk.f32.mxu0 %vm1871_vm0, %v1872_v1  ;;  %1603 = vmatpush3.bf16.msra.mxu0 %v1602_v49 }
  0x91   : > { %1604 = vmatprep.subr.bf16.mxu0 %v1870_v0 }
  0x92   : > { %1594 = vmatpush3.bf16.msra.mxu1 %v1593_v20  ;;  %v1227_v20 = vld [vmem:[%s2361_s14] sm:$0xff] }
  0x93   : > { %1532 = vmatprep.subr.mxu1 %v1872_v1 }
  0x94   : > { %1606 = vmatpush3.bf16.msra.mxu0 %v1605_v51 }
  0x95   : > { %1519 = vmatmul.mubr.msk.f32.vlgmr.msra.gmra.mrb[2].mxu1 %vm646_vm1, %v2191_v16  ;;  %1613 = vmatprep.subr.bf16.mxu0 %v1870_v0 }
  0x96   : > { %1534 = vmatprep.mubr.msk.f32.mxu1 %vm1871_vm0, %v1872_v1 }
 0x160   : > { %v716_v23 = vpop.f32.mrb[0].mxu1 }
 0x161   : > { %v717_v24 = vadd.f32 %v1447_v21, %v716_v23  ;;  %v1509_v25 = vpop.f32.mrb[1].mxu1  ;;  %v872_v26 = vpop.f32.mrb[0].mxu0  ;;  %v1228_v21 = vld [vmem:[%s2361_s14 + $0x8] sm:$0xff]  ;;  %v1229_v23 = vld [vmem:[%s2361_s14 + $0x10] sm:$0xff] }
 0x162   : > { %v873_v27 = vadd.f32 %v872_v26, %v805_v22  ;;  %v1531_v28 = vpop.f32.mrb[1].mxu0  ;;  %v1614_v22 = vpack.c.bf16 %v1228_v21, %v1227_v20  ;;  %v1231_v26 = vld [vmem:[%s2361_s14 + $0x20] sm:$0xff] }
 0x163   : > { %1533 = vmatpush3.xpose.msk.msra.mxu1 %vm646_vm1, %v717_v24  ;;  %v1230_v24 = vld [vmem:[%s2361_s14 + $0x18] sm:$0xff] }
 0x164   : > { %1537 = vmatprep.subr.mxu1 %v1872_v1  ;;  %v1617_v25 = vpack.c.bf16 %v1230_v24, %v1229_v23 }
 0x166   : > { %1535 = vmatmul.mubr.msk.f32.vlgmr.msra.gmra.mrb[4].mxu1 %vm646_vm1, %v873_v27  ;;  %v1232_v27 = vld [vmem:[%s2361_s14 + $0x28] sm:$0xff] }
 0x167   : > { %1539 = vmatprep.mubr.msk.f32.mxu1 %vm1871_vm0, %v1872_v1  ;;  %v1620_v28 = vpack.c.bf16 %v1232_v27, %v1231_v26 }
 0x168   : > { %v797_v30 = vpop.f32.mrb[2].mxu1 }
 0x169   : > { %v798_v31 = vadd.f32 %v1449_v29, %v797_v30  ;;  %v1520_v32 = vpop.f32.mrb[3].mxu1  ;;  %v1233_v29 = vld [vmem:[%s2361_s14 + $0x30] sm:$0xff]  ;;  %v1234_v30 = vld [vmem:[%s2361_s14 + $0x38] sm:$0xff] }
 0x16a   : > { %v1144_v32 = vld [vmem:[%s2403_s27] sm:$0x1]  ;;  %s629_s27 = scalar_lea.vmem [#allocation8], %s2138_s5 }
 0x16b   : > { %1538 = vmatpush3.msra.mxu1 %v798_v31  ;;  %v1623_v31 = vpack.c.bf16 %v1234_v30, %v1233_v29  ;;  %s1342_s22 = sshll.u32 %s629_s27, 4  ;;  %s2304_s22 = int_to_ptr.vmem [resolvable:$true] %s1342_s22 }
 0x16c   : > { %1607 = vmatprep.subr.bf16.mxu1 %v1870_v0  ;;  %s1793_s1 = scalar_lea.vmem %s2304_s22, 16 }
 0x16d   : > { %p1794_p0 = scmp.ne.s32.totalorder %s2304_s22, %s1793_s1 }
 0x16f   : > { %p1795_p3 = pnand %p1794_p0, %p2408_p1 }
 0x171   : > { %p1796_p7 = pneg %p1795_p3 }
 0x239   : > { %v948_v36 = vpop.f32.mrb[4].mxu1 }
 0x23a   : > { %v952_v37 = vmul.f32 0.17677669, %v948_v36  ;;  %v1536_v38 = vpop.f32.mrb[5].mxu1 }
 0x23c   : > { %v955_v39 = vsub.f32 %v952_v37, %v954_v35 }
 0x23e   : > { %v957_v40 = vsel %vm956_vm2, %v955_v39, -inf }
 0x23f   : > { %958 = vmax.xlane.f32.xlu0 %v957_v40 }
 0x2cc   : > { %v959_v41 = vpop.xlane.xlu0 %958 }
 0x2cd   : > { %v960_v42 = vsub.f32 %v955_v39, %v959_v41 }
 0x2cf   : > { %v961_v43 = vmul.f32 1.442695, %v960_v42 }
 0x2d1   : > { %1697 = vpow2.f32 %v961_v43 }
 0x2db   : > { %v1698_v44 = vpop.eup %1697 }
 0x2dc   : > { %v963_v45 = vsel %vm956_vm2, %v1698_v44, 0.0 }
 0x2dd   : > { %964 = vadd.xlane.f32.xlu0 %v963_v45 }
 0x36a   : > { %v965_v52 = vpop.xlane.xlu0 %964 }
 0x36b   : > { %1699 = vrcp.f32 %v965_v52 }
 0x375   : > { %v1700_v53 = vpop.eup %1699 }
 0x376   : > { %v967_v54 = vmul.f32 %v1700_v53, %v1698_v44  ;;  %v1235_v44 = vld [vmem:[%s2404_s17] sm:$0x1] }
 0x378   : > { %1540 = vmatmul.mubr.msk.f32.vlgmr.msra.gmra.mrb[6].mxu1 %vm968_vm3, %v967_v54 }
 0x379   : > { %1561 = vmatprep.mubr.msk.f32.mxu1 %vm1871_vm0, %v1872_v1 }
 0x44b   : > { %v1038_v55 = vpop.f32.mrb[6].mxu1 }
 0x44c   : > { %v1541_v56 = vpop.f32.mrb[7].mxu1  ;;  %1551 = vmatmul.mubr.msk.f32.vlgmr.msra.gmra.mrb[2].mxu0 %vm646_vm1, %v1038_v55 }
 0x44d   : > { %1580 = vmatprep.mubr.msk.f32.mxu0 %vm1871_vm0, %v1872_v1  ;;  %v1140_v1 = vld [vmem:[#allocation7] sm:$0xff]  ;;  %1615 = vmatpush3.bf16.msra.mxu0 %v1614_v22 }
 0x44e   : > { %v1608_v7 = vpack.c.bf16 %v1141_v6, %v1140_v1  ;;  %1616 = vmatprep.subr.bf16.mxu0 %v1870_v0 }
 0x450   : > { %1609 = vmatpush3.bf16.msra.mxu1 %v1608_v7 }
 0x451   : > { %1610 = vmatprep.subr.bf16.mxu1 %v1870_v0  ;;  %1618 = vmatpush3.bf16.msra.mxu0 %v1617_v25 }
 0x452   : > { %1619 = vmatprep.subr.bf16.mxu0 %v1870_v0 }
 0x454   : > { %1612 = vmatpush3.bf16.msra.mxu1 %v1611_v10 }
 0x455   : > { %1621 = vmatpush3.bf16.msra.mxu0 %v1620_v28 }
 0x456   : > { %1622 = vmatprep.subr.bf16.mxu0 %v1870_v0 }
 0x459   : > { %1624 = vmatpush3.bf16.msra.mxu0 %v1623_v31 }
 0x51f   : > { %v1116_v58 = vpop.f32.mrb[2].mxu0 }
 0x520   : > { %v1117_v59 = vadd.f32 %v1116_v58, %v1046_v57  ;;  %v1552_v60 = vpop.f32.mrb[3].mxu0 }
 0x522   : > { %v1120_v61 = vadd.f32 %v1117_v59, %v2191_v16  ;;  %v1311_v59 = vld [vmem:[%s2405_s21] sm:$0x1]  ;;  %s1797_s21 = sshll.u32 %s1873_s0, 4  ;;  %s1798_s21 = int_to_ptr.vmem [resolvable:$false] %s1797_s21 }
 0x523   : > { %s1799_s2 = scalar_lea.vmem %s1798_s21, 32  ;;  %p1800_p9 = scmp.lt.s32.totalorder %s2304_s22, %s1798_s21 }
 0x524   : > { %v1124_v62 = vsel %vm1123_vm4, %v1120_v61, 0.0  ;;  %p1801_p12 = scmp.lt.s32.totalorder %s1799_s2, %s1793_s1 }
 0x525   : > { %1125 = vadd.xlane.f32.xlu1 %v1124_v62 }
 0x526   : > { %p1802_p2 = por %p1801_p12, %p1800_p9 }
 0x528   : > { %p1803_p13 = pnand %p1802_p2, %p1796_p7 }
 0x5b2   : > { %v1126_v63 = vpop.xlane.xlu1 %1125 }
 0x5b3   : > { %v1128_v2 = vmul.f32 0.03125, %v1126_v63 }
 0x5b5   : > { %v1129_v3 = vsub.f32 %v1120_v61, %v1128_v2  ;;  %v1312_v61 = vld [vmem:[%s2406_s19] sm:$0x1] }
 0x5b7   : > { %v1130_v4 = vmul.f32 %v1129_v3, %v1129_v3 }
 0x5b9   : > { %v1131_v5 = vsel %vm1123_vm4, %v1130_v4, 0.0 }
 0x5ba   : > { %1132 = vadd.xlane.f32.xlu1 %v1131_v5 }
 0x647   : > { %v1133_v11 = vpop.xlane.xlu1 %1132 }
 0x648   : > { %v1134_v12 = vmul.f32 0.03125, %v1133_v11 }
 0x64a   : > { %v1135_v13 = vadd.f32 1e-12, %v1134_v12 }
 0x64c   : > { %1701 = vrsqrt.f32 %v1135_v13 }
 0x656   : > { %v1702_v14 = vpop.eup %1701 }
 0x657   : > { %v1137_v16 = vmul.f32 %v1702_v14, %v1129_v3 }
 0x659   : > { %v1138_v18 = vmul.f32 %v1137_v16, %v1121_v15 }
 0x65b   : > { %v1139_v19 = vadd.f32 %v1138_v18, %v1122_v17 }
 0x65d   : > { %1562 = vmatmul.mubr.msk.f32.vlgmr.msra.gmra.mrb[8].mxu1 %vm646_vm1, %v1139_v19 }
 0x730   : > { %v1214_v33 = vpop.f32.mrb[8].mxu1 }
 0x731   : > { %v1215_v34 = vadd.f32 %v1214_v33, %v1144_v32  ;;  %v1563_v35 = vpop.f32.mrb[9].mxu1 }
 0x733   : > { %v1218_v36 = vmul.f32 %v1215_v34, %v1215_v34 }
 0x735   : > { %v1219_v37 = vmul.f32 %v1218_v36, %v1215_v34 }
 0x737   : > { %v1220_v0 = vmul.f32 0.044715, %v1219_v37 }
 0x739   : > { %v1221_v38 = vadd.f32 %v1220_v0, %v1215_v34 }
 0x73b   : > { %v1222_v39 = vmul.f32 0.7978846, %v1221_v38 }
 0x73d   : > { %1703 = vtanh.f32 %v1222_v39 }
 0x747   : > { %v1704_v40 = vpop.eup %1703 }
 0x748   : > { %v1224_v41 = vadd.f32 1.0, %v1704_v40 }
 0x74a   : > { %v1225_v42 = vmul.f32 0.5, %v1224_v41 }
 0x74c   : > { %v1226_v43 = vmul.f32 %v1225_v42, %v1215_v34 }
 0x74e   : > { %1581 = vmatmul.mubr.msk.f32.vlgmr.msra.gmra.mrb[4].mxu0 %vm1236_vm5, %v1226_v43 }
 0x821   : > { %v1306_v45 = vpop.f32.mrb[4].mxu0 }
 0x822   : > { %v1307_v46 = vadd.f32 %v1306_v45, %v1235_v44  ;;  %v1582_v47 = vpop.f32.mrb[5].mxu0 }
 0x824   : > { %v1310_v48 = vadd.f32 %v1307_v46, %v1139_v19 }
 0x826   : > { %v1313_v49 = vsel %vm1123_vm4, %v1310_v48, 0.0 }
 0x827   : > { %1314 = vadd.xlane.f32.xlu0 %v1313_v49 }
 0x8b4   : > { %v1315_v50 = vpop.xlane.xlu0 %1314 }
 0x8b5   : > { %v1316_v51 = vmul.f32 0.03125, %v1315_v50 }
 0x8b7   : > { %v1317_v52 = vsub.f32 %v1310_v48, %v1316_v51 }
 0x8b9   : > { %v1318_v53 = vmul.f32 %v1317_v52, %v1317_v52 }
 0x8bb   : > { %v1319_v54 = vsel %vm1123_vm4, %v1318_v53, 0.0 }
 0x8bc   : > { %1320 = vadd.xlane.f32.xlu1 %v1319_v54 }
 0x949   : > { %v1321_v55 = vpop.xlane.xlu1 %1320 }
 0x94a   : > { %v1322_v56 = vmul.f32 0.03125, %v1321_v55 }
 0x94c   : > { %v1323_v57 = vadd.f32 1e-12, %v1322_v56 }
 0x94e   : > { %1705 = vrsqrt.f32 %v1323_v57 }
 0x958   : > { %v1706_v58 = vpop.eup %1705 }
 0x959   : > { %v1325_v60 = vmul.f32 %v1706_v58, %v1317_v52 }
 0x95b   : > { %v1326_v62 = vmul.f32 %v1325_v60, %v1311_v59 }
 0x95d   : > { %v1327_v63 = vadd.f32 %v1326_v62, %v1312_v61 }
 0x95f   : > { %1328 = vst.msk [vmem:[%s629_s27] sm:$0x1] %vm1123_vm4, %v1327_v63 }
 0x960   : > { %1806 = shalt.err (!%p1803_p13)
}
 0x961   : > { %s1807_s5 = scalar_lea.hbm %s2302_s4, 16  ;;  %s1811_s23 = scalar_lea.hbm %s2407_s3, 32 }
 0x962   : > { %p1808_p6 = scmp.ne.s32.totalorder %s2302_s4, %s1807_s5  ;;  %p1812_p5 = scmp.lt.u32.totalorder %s2302_s4, %s2407_s3 }
 0x963   : > { %p1813_p8 = scmp.lt.u32.totalorder %s1811_s23, %s1807_s5  ;;  %p1815_p0 = scmp.lt.u32.totalorder %s1807_s5, %s2302_s4 }
 0x964   : > { %p1809_p10 = pnand %p1808_p6, %p2408_p1 }
 0x965   : > { %p1814_p11 = por %p1813_p8, %p1812_p5 }
 0x966   : > { %p1810_p4 = pneg %p1809_p10 }
 0x967   : > { %p1816_p3 = por %p1815_p0, %p1814_p11 }
 0x969   : > { %p1817_p7 = pnand %p1816_p3, %p1810_p4 }
 0x96b   : > { %1820 = shalt.err (!%p1817_p7)
}
 0x96c   : > { %1635 = dma.vmem_to_hbm [thread:$0]  (%p2408_p1), %s2304_s22, 16, %s2302_s4, %s1330_s13  }
 0x96d PF: > { %s2409_s17 = sld [smem:[#allocation12_spill]]  ;;  %s2410_s1 = sld [smem:[#allocation13_spill]] }
 0x96e   : > { %p2412_p12 = scmp.ge.s32.totalorder %s1863_s30, 2 }
 0x973   : > { %s1354_s0 = sand.u32 1, %s2409_s17   ;;  %p2411_p9 = scmp.ne.s32.totalorder %s2410_s1, 0 }
 0x974   : > { %s1355_s21 = scalar_lea.sflag [#allocation4], %s1354_s0 }
 0x975   : > { %p1649_p2 = pnand %p2412_p12, %p2411_p9 }
 0x977   : > { %1846 = dma.done.wait (!%p1649_p2), %s1355_s21, 16  }
 0x978   : > { %1848 = vsyncadd (!%p1649_p2), %s1355_s21, 4294967280  ;;  %p32_p13 = scmp.ge.s32.totalorder %s2079_s16, 4   ;;  %s2413_s27 = smov %s1855_s28 }
 0x979   : > { %s2414_s28 = smov %s1859_s29  ;;  %s2415_s29 = smov %s2095_s26 }
 0x97a   : > { %s2416_s30 = smov %s2079_s16  ;;  %34 = sbr.rel (!%p32_p13) target bundleno = 18 (0x12), region = 148 }
 0x981   :  { %1359 = vsyncpa [#allocation3], 1 }
 0x982   :  { %1361 = vsyncpa [#allocation3 + $0x1], 1 }
 0x983   :  { %1362 = vsyncpa [#allocation6], 1 }
 0x984   :  { %1363 = vsyncpa [#allocation4], 1 }
 0x985   :  { %1365 = vsyncpa [#allocation4 + $0x1], 1 }

</bundles_post_ra>
